<compile_context>
chip_gen: v7x
topology: tpu7x:2x2x1
jax: 0.10.0
libtpu: 0.0.40
codegen_flags: <defaults>
</compile_context>

<pallas_src>
import math
import jax
import jax.numpy as jnp
from jax import lax
from jax.experimental import pallas as pl
from jax.experimental.pallas import tpu as pltpu

# ---------------- model hyper-parameters (synthetic, deterministic) -----------
B = 2            # batch
N = 8            # number of nodes (sequence length)
C_IN = 32        # in_channels (divisible by num_heads)
C_OUT = 32       # out_channels (== C_IN so all square weights share one slab width)
NUM_HEADS = 4
HEAD_DIM = C_IN // NUM_HEADS
NEG_SLOPE = 0.2
LN_EPS = 1e-5

BN = B * N                     # flattened rows                     (16)
BHN = B * NUM_HEADS * N        # block-diagonal attention width     (64)
C3 = 3 * C_IN                  # fused QKV width                    (96)
SLAB_W = C3                    # lane width of the packed parameter slab

# ---- packed-slab row offsets (all multiples of 8 -> clean sublane slices) ----
R_WQKV = 0                     # (C_IN, C3)   fused, pre-transposed, scale folded into wq
R_VECS = R_WQKV + C_IN         # 32  (8, C3)  biases + LN params
R_WO = R_VECS + 8              # 40  (C_IN, C_OUT)
R_W1 = R_WO + C_IN             # 72  (C_IN, C_OUT)
R_W2 = R_W1 + C_IN             # 104 (C_OUT, C_OUT)
R_HMASK = R_W2 + C_OUT         # 136 (BHN, C_IN)   head channel block-diag mask
R_GMASK = R_HMASK + BHN        # 200 (BHN, BHN)    same-(batch,head) group mask
R_BMASK = R_GMASK + BHN        # 264 (BN, BHN)     same-batch 0/1 mask
SLAB_ROWS = R_BMASK + BN       # 280

# individual rows inside the vecs region
R_BQKV = R_VECS + 0
R_LN1G = R_VECS + 1
R_LN1B = R_VECS + 2
R_BO = R_VECS + 3
R_B1 = R_VECS + 4
R_B2 = R_VECS + 5
R_LN2G = R_VECS + 6
R_LN2B = R_VECS + 7


def transformer_conv_kernel(x_ref, p_ref, o_ref):
    # x_ref: (BN, C_IN) flattened (batch*node, channel)
    # p_ref: (SLAB_ROWS, SLAB_W) packed weights + biases + LN params + attention masks
    # o_ref: (BN, C_OUT)
    x = x_ref[...]                                                    # (16, 32) f32

    # ---- LayerNorm 1 (over channels) ----
    mu = jnp.mean(x, axis=-1, keepdims=True)
    var = jnp.mean((x - mu) * (x - mu), axis=-1, keepdims=True)
    xn = (x - mu) * lax.rsqrt(var + LN_EPS)
    xn = xn * p_ref[R_LN1G:R_LN1G + 1, 0:C_IN] + p_ref[R_LN1B:R_LN1B + 1, 0:C_IN]

    # ---- fused QKV projection: one (BN, C) x (C, 3C) MXU matmul ----
    # (1/sqrt(HEAD_DIM) already folded into the wq columns and bq at pack time)
    qkv = jnp.dot(xn, p_ref[R_WQKV:R_WQKV + C_IN, :],
                  preferred_element_type=jnp.float32)                 # (16, 96)
    qkv = qkv + p_ref[R_BQKV:R_BQKV + 1, :]

    q = qkv[:, 0 * C_IN:1 * C_IN]                                     # (16, 32), pre-scaled
    k = qkv[:, 1 * C_IN:2 * C_IN]
    v = qkv[:, 2 * C_IN:3 * C_IN]

    # ---- host-precomputed masks (ride in the parameter slab) ----
    head_mask = p_ref[R_HMASK:R_HMASK + BHN, 0:C_IN]                  # (64, 32)
    group_mask = p_ref[R_GMASK:R_GMASK + BHN, 0:BHN]                  # (64, 64)
    batch_mask = p_ref[R_BMASK:R_BMASK + BN, 0:BHN]                   # (16, 64)

    # ---- batch-extended block-diagonal K / V ----
    # key row j = h*BN + b*N + n : key n of batch b, head h; off-head channels zeroed
    kt = head_mask * jnp.concatenate([k] * NUM_HEADS, axis=0)         # (64, 32)
    vt = head_mask * jnp.concatenate([v] * NUM_HEADS, axis=0)         # (64, 32)

    # scores for ALL batches and heads in one matmul: (16, 32) x (32, 64)^T
    s = lax.dot_general(q, kt, (((1,), (1,)), ((), ())),
                        preferred_element_type=jnp.float32)           # (16, 64)
    # global row max is a per-row constant shift -> valid for every (batch, head) group
    m = jnp.max(s, axis=-1, keepdims=True)
    e = jnp.exp(s - m)
    # per-(batch,head) softmax denominators broadcast to every column of the group
    denom = jnp.dot(e, group_mask, preferred_element_type=jnp.float32)  # (16, 64)
    # EUP reciprocal; zero cross-batch columns AFTER the reciprocal (denom stays nonzero)
    probs = (e * batch_mask) * pl.reciprocal(denom, approx=True)      # (16, 64)
    # P @ block-diag(V): heads land already concatenated along channels
    attn = jnp.dot(probs, vt, preferred_element_type=jnp.float32)     # (16, 32)

    attn = jnp.dot(attn, p_ref[R_WO:R_WO + C_IN, 0:C_OUT],
                   preferred_element_type=jnp.float32)
    attn = attn + p_ref[R_BO:R_BO + 1, 0:C_IN]

    # ---- residual ----
    y = x + attn

    # ---- fc1 + LeakyReLU (dropout = identity in eval mode) ----
    y = jnp.dot(y, p_ref[R_W1:R_W1 + C_IN, 0:C_OUT],
                preferred_element_type=jnp.float32)
    y = y + p_ref[R_B1:R_B1 + 1, 0:C_OUT]
    y = jnp.where(y >= 0.0, y, NEG_SLOPE * y)
    # TODO(synk): dropout layers are identity here (eval mode / deterministic run)

    # ---- fc2, then X = X + X ----
    y = jnp.dot(y, p_ref[R_W2:R_W2 + C_OUT, 0:C_OUT],
                preferred_element_type=jnp.float32)
    y = y + p_ref[R_B2:R_B2 + 1, 0:C_OUT]
    y = y + y

    # ---- LayerNorm 2 ----
    mu2 = jnp.mean(y, axis=-1, keepdims=True)
    var2 = jnp.mean((y - mu2) * (y - mu2), axis=-1, keepdims=True)
    yn = (y - mu2) * lax.rsqrt(var2 + LN_EPS)
    yn = yn * p_ref[R_LN2G:R_LN2G + 1, 0:C_OUT] + p_ref[R_LN2B:R_LN2B + 1, 0:C_OUT]

    # Output stays (BN, C_OUT); at 16x32 (2 KB) the masked vst is negligible. Revisit
    # with a lane-dense (B, N*C_OUT) slab if BN grows while C_OUT stays < 128.
    o_ref[...] = yn.astype(o_ref.dtype)


def pack_params(p):
    """One-time host-side packing of all parameters + attention masks into ONE slab."""
    scale = 1.0 / math.sqrt(HEAD_DIM)
    wq = p["wq"] * scale                       # fold attention scale into wq / bq
    bq = p["bq"] * scale
    wqkv = jnp.concatenate([wq, p["wk"], p["wv"]], axis=1)            # (32, 96)

    def pad_w(a):                              # (r, c) -> (r, SLAB_W)
        return jnp.pad(a, ((0, 0), (0, SLAB_W - a.shape[1])))

    vec_rows = jnp.concatenate([
        jnp.concatenate([bq, p["bk"], p["bv"]], axis=1),              # R_BQKV
        pad_w(p["ln1_g"]), pad_w(p["ln1_b"]),                         # R_LN1G, R_LN1B
        pad_w(p["bo"]), pad_w(p["b1"]), pad_w(p["b2"]),               # R_BO, R_B1, R_B2
        pad_w(p["ln2_g"]), pad_w(p["ln2_b"]),                         # R_LN2G, R_LN2B
    ], axis=0)                                                        # (8, 96)

    # attention masks: key row j = h*BN + b*N + n (head-major, batch, key)
    j = jnp.arange(BHN)
    j_head = j // BN
    j_batch = (j % BN) // N
    c = jnp.arange(C_IN)
    head_mask = (j_head[:, None] == (c[None, :] // HEAD_DIM)).astype(jnp.float32)   # (64,32)
    group_mask = ((j_head[:, None] == j_head[None, :]) &
                  (j_batch[:, None] == j_batch[None, :])).astype(jnp.float32)       # (64,64)
    i_batch = jnp.arange(BN) // N
    batch_mask = (i_batch[:, None] == j_batch[None, :]).astype(jnp.float32)         # (16,64)

    slab = jnp.concatenate([
        wqkv,                                        # R_WQKV
        vec_rows,                                    # R_VECS
        pad_w(p["wo"]), pad_w(p["w1"]), pad_w(p["w2"]),   # R_WO, R_W1, R_W2
        pad_w(head_mask),                            # R_HMASK
        pad_w(group_mask),                           # R_GMASK
        pad_w(batch_mask),                           # R_BMASK
    ], axis=0).astype(jnp.float32)                   # (280, 96)
    assert slab.shape == (SLAB_ROWS, SLAB_W)
    return slab


def transformer_conv_forward(x, slab):
    """x: (B, N, C_IN) f32, slab: packed params -> (B, N, C_OUT) f32."""
    x2d = x.reshape(BN, C_IN)

    matmul_flops = (
        2 * BN * C_IN * C3                        # fused QKV
        + 2 * BN * BHN * C_IN                     # scores
        + 2 * BN * BHN * BHN                      # group softmax sums
        + 2 * BN * BHN * C_IN                     # PV
        + 3 * (2 * BN * C_IN * C_OUT)             # out_proj, fc1, fc2
    )
    cost = pl.CostEstimate(
        flops=matmul_flops,
        transcendentals=2 * BN * BHN + 2 * BN,    # exp + reciprocal + rsqrt
        bytes_accessed=4 * (x2d.size + SLAB_ROWS * SLAB_W + BN * C_OUT),
    )

    out2d = pl.pallas_call(
        transformer_conv_kernel,
        out_shape=jax.ShapeDtypeStruct((BN, C_OUT), jnp.float32),
        grid_spec=pltpu.PrefetchScalarGridSpec(
            num_scalar_prefetch=0,
            grid=(1,),                            # whole problem is one block
            in_specs=[
                pl.BlockSpec((BN, C_IN), lambda i: (0, 0)),
                pl.BlockSpec((SLAB_ROWS, SLAB_W), lambda i: (0, 0)),
            ],
            out_specs=pl.BlockSpec((BN, C_OUT), lambda i: (0, 0)),
        ),
        compiler_params=pltpu.CompilerParams(
            dimension_semantics=("arbitrary",)),
        cost_estimate=cost,
    )(x2d, slab)
    return out2d.reshape(B, N, C_OUT)


def init_params(key):
    """Deterministic synthetic parameters mirroring the torch module's shapes."""
    ks = jax.random.split(key, 8)
    sd = 0.1
    # nn.MultiheadAttention: in_proj_weight (3C, C), out_proj (C, C)
    in_proj_w = jax.random.normal(ks[0], (3 * C_IN, C_IN), jnp.float32) * sd
    in_proj_b = jax.random.normal(ks[1], (3 * C_IN,), jnp.float32) * sd
    out_proj_w = jax.random.normal(ks[2], (C_IN, C_IN), jnp.float32) * sd
    out_proj_b = jax.random.normal(ks[3], (C_IN,), jnp.float32) * sd
    fc1_w = jax.random.normal(ks[4], (C_OUT, C_IN), jnp.float32) * sd
    fc1_b = jax.random.normal(ks[5], (C_OUT,), jnp.float32) * sd
    fc2_w = jax.random.normal(ks[6], (C_OUT, C_OUT), jnp.float32) * sd
    fc2_b = jax.random.normal(ks[7], (C_OUT,), jnp.float32) * sd

    def row(v):   # 1-D (C,) -> (1, C) for TPU-friendly 2-D layout
        return v.reshape(1, -1)

    return {
        "ln1_g": row(jnp.ones((C_IN,), jnp.float32)),
        "ln1_b": row(jnp.zeros((C_IN,), jnp.float32)),
        # pre-transpose so the kernel computes  x @ W
        "wq": in_proj_w[0 * C_IN:1 * C_IN].T,
        "wk": in_proj_w[1 * C_IN:2 * C_IN].T,
        "wv": in_proj_w[2 * C_IN:3 * C_IN].T,
        "bq": row(in_proj_b[0 * C_IN:1 * C_IN]),
        "bk": row(in_proj_b[1 * C_IN:2 * C_IN]),
        "bv": row(in_proj_b[2 * C_IN:3 * C_IN]),
        "wo": out_proj_w.T,
        "bo": row(out_proj_b),
        "w1": fc1_w.T,
        "b1": row(fc1_b),
        "w2": fc2_w.T,
        "b2": row(fc2_b),
        "ln2_g": row(jnp.ones((C_OUT,), jnp.float32)),
        "ln2_b": row(jnp.zeros((C_OUT,), jnp.float32)),
    }


def reference_forward(x, p):
    """Pure-JAX reference of the torch forward (eval mode)."""
    def ln(v, g, b):
        mu = jnp.mean(v, axis=-1, keepdims=True)
        var = jnp.mean((v - mu) ** 2, axis=-1, keepdims=True)
        return (v - mu) * lax.rsqrt(var + LN_EPS) * g + b

    xn = ln(x, p["ln1_g"][0], p["ln1_b"][0])
    q = xn @ p["wq"] + p["bq"][0]
    k = xn @ p["wk"] + p["bk"][0]
    v = xn @ p["wv"] + p["bv"][0]

    def split_heads(t):  # (B, N, C) -> (B, H, N, D)
        return t.reshape(B, N, NUM_HEADS, HEAD_DIM).transpose(0, 2, 1, 3)

    qh, kh, vh = split_heads(q), split_heads(k), split_heads(v)
    s = jnp.einsum("bhnd,bhmd->bhnm", qh, kh) / math.sqrt(HEAD_DIM)
    pattn = jax.nn.softmax(s, axis=-1)
    oh = jnp.einsum("bhnm,bhmd->bhnd", pattn, vh)
    attn = oh.transpose(0, 2, 1, 3).reshape(B, N, C_IN) @ p["wo"] + p["bo"][0]

    y = x + attn
    y = y @ p["w1"] + p["b1"][0]
    y = jnp.where(y >= 0, y, NEG_SLOPE * y)
    y = y @ p["w2"] + p["b2"][0]
    y = y + y
    return ln(y, p["ln2_g"][0], p["ln2_b"][0])


if __name__ == "__main__":
    key = jax.random.PRNGKey(0)
    kx, kp = jax.random.split(key)
    x = jax.random.normal(kx, (B, N, C_IN), jnp.float32)
    params = init_params(kp)
    slab = pack_params(params)        # one-time parameter packing (outside the hot path)

    fwd = jax.jit(transformer_conv_forward)
    out = fwd(x, slab)
    out = jax.block_until_ready(out)

    ref = reference_forward(x, params)
    assert out.shape == (B, N, C_OUT)
    max_err = float(jnp.max(jnp.abs(out - ref)))
    # Tolerance relaxed vs. exact f32 because the softmax denominator uses the EUP
    # approximate reciprocal (pl.reciprocal(approx=True)).
    assert jnp.allclose(out, ref, atol=2e-3, rtol=2e-3), (
        "mismatch vs reference: max err %e" % max_err)

    print("KERNEL_OK")
</pallas_src>

<mosaic_0001>
module attributes {stable_mosaic.version = 11 : i64} {
  func.func @transformer_conv_kernel(%arg0: i32, %arg1: memref<16x32xf32, #tpu.memory_space<vmem>>, %arg2: memref<280x96xf32, #tpu.memory_space<vmem>>, %arg3: memref<16x32xf32, #tpu.memory_space<vmem>>) attributes {dimension_semantics = [#tpu.dimension_semantics<arbitrary>], iteration_bounds = array<i64: 1>, scalar_prefetch = 0 : i64, scratch_operands = 0 : i64, tpu.core_type = #tpu.core_type<tc>, window_params = [{pipeline_mode = #tpu.pipeline_mode<synchronous>, transform_indices = @transform_0, window_bounds = array<i64: 16, 32>}, {pipeline_mode = #tpu.pipeline_mode<synchronous>, transform_indices = @transform_1, window_bounds = array<i64: 280, 96>}, {pipeline_mode = #tpu.pipeline_mode<synchronous>, transform_indices = @transform_2, window_bounds = array<i64: 16, 32>}]} {
    %c0 = arith.constant 0 : index
    %c0_0 = arith.constant 0 : index
    %0 = vector.load %arg1[%c0, %c0_0] : memref<16x32xf32, #tpu.memory_space<vmem>>, vector<16x32xf32>
    %cst = arith.constant dense<0.000000e+00> : vector<16xf32>
    %1 = vector.multi_reduction <add>, %0, %cst [1] : vector<16x32xf32> to vector<16xf32>
    %2 = vector.shape_cast %1 : vector<16xf32> to vector<16x1xf32>
    %cst_1 = arith.constant 3.200000e+01 : f32
    %3 = vector.broadcast %cst_1 : f32 to vector<16x1xf32>
    %4 = arith.divf %2, %3 : vector<16x1xf32>
    %5 = vector.broadcast %4 : vector<16x1xf32> to vector<16x32xf32>
    %6 = arith.subf %0, %5 : vector<16x32xf32>
    %7 = vector.broadcast %4 : vector<16x1xf32> to vector<16x32xf32>
    %8 = arith.subf %0, %7 : vector<16x32xf32>
    %9 = arith.mulf %6, %8 : vector<16x32xf32>
    %cst_2 = arith.constant dense<0.000000e+00> : vector<16xf32>
    %10 = vector.multi_reduction <add>, %9, %cst_2 [1] : vector<16x32xf32> to vector<16xf32>
    %11 = vector.shape_cast %10 : vector<16xf32> to vector<16x1xf32>
    %cst_3 = arith.constant 3.200000e+01 : f32
    %12 = vector.broadcast %cst_3 : f32 to vector<16x1xf32>
    %13 = arith.divf %11, %12 : vector<16x1xf32>
    %14 = vector.broadcast %4 : vector<16x1xf32> to vector<16x32xf32>
    %15 = arith.subf %0, %14 : vector<16x32xf32>
    %cst_4 = arith.constant 9.99999974E-6 : f32
    %16 = vector.broadcast %cst_4 : f32 to vector<16x1xf32>
    %17 = arith.addf %13, %16 : vector<16x1xf32>
    %18 = math.rsqrt %17 : vector<16x1xf32>
    %19 = vector.broadcast %18 : vector<16x1xf32> to vector<16x32xf32>
    %20 = arith.mulf %15, %19 : vector<16x32xf32>
    %c33 = arith.constant 33 : index
    %c0_5 = arith.constant 0 : index
    %21 = vector.load %arg2[%c33, %c0_5] : memref<280x96xf32, #tpu.memory_space<vmem>>, vector<1x32xf32>
    %22 = vector.broadcast %21 : vector<1x32xf32> to vector<16x32xf32>
    %23 = arith.mulf %20, %22 : vector<16x32xf32>
    %c34 = arith.constant 34 : index
    %c0_6 = arith.constant 0 : index
    %24 = vector.load %arg2[%c34, %c0_6] : memref<280x96xf32, #tpu.memory_space<vmem>>, vector<1x32xf32>
    %25 = vector.broadcast %24 : vector<1x32xf32> to vector<16x32xf32>
    %26 = arith.addf %23, %25 : vector<16x32xf32>
    %c0_7 = arith.constant 0 : index
    %c0_8 = arith.constant 0 : index
    %27 = vector.load %arg2[%c0_7, %c0_8] : memref<280x96xf32, #tpu.memory_space<vmem>>, vector<32x96xf32>
    %cst_9 = arith.constant dense<0.000000e+00> : vector<16x96xf32>
    %28 = tpu.matmul %26, %27, %cst_9 {dimension_numbers = #tpu.dot_dimension_numbers<[1], [0], [0], [1], [0, 0, 1, 1], [], []>} : vector<16x32xf32>, vector<32x96xf32>, vector<16x96xf32> -> vector<16x96xf32>
    %c32 = arith.constant 32 : index
    %c0_10 = arith.constant 0 : index
    %29 = vector.load %arg2[%c32, %c0_10] : memref<280x96xf32, #tpu.memory_space<vmem>>, vector<1x96xf32>
    %30 = vector.broadcast %29 : vector<1x96xf32> to vector<16x96xf32>
    %31 = arith.addf %28, %30 : vector<16x96xf32>
    %32 = vector.extract_strided_slice %31 {offsets = [0, 0], sizes = [16, 32], strides = [1, 1]} : vector<16x96xf32> to vector<16x32xf32>
    %33 = vector.extract_strided_slice %31 {offsets = [0, 32], sizes = [16, 32], strides = [1, 1]} : vector<16x96xf32> to vector<16x32xf32>
    %34 = vector.extract_strided_slice %31 {offsets = [0, 64], sizes = [16, 32], strides = [1, 1]} : vector<16x96xf32> to vector<16x32xf32>
    %c136 = arith.constant 136 : index
    %c0_11 = arith.constant 0 : index
    %35 = vector.load %arg2[%c136, %c0_11] : memref<280x96xf32, #tpu.memory_space<vmem>>, vector<64x32xf32>
    %c200 = arith.constant 200 : index
    %c0_12 = arith.constant 0 : index
    %36 = vector.load %arg2[%c200, %c0_12] : memref<280x96xf32, #tpu.memory_space<vmem>>, vector<64x64xf32>
    %c264 = arith.constant 264 : index
    %c0_13 = arith.constant 0 : index
    %37 = vector.load %arg2[%c264, %c0_13] : memref<280x96xf32, #tpu.memory_space<vmem>>, vector<16x64xf32>
    %38 = tpu.concatenate %33, %33, %33, %33 in 0 : vector<16x32xf32>, vector<16x32xf32>, vector<16x32xf32>, vector<16x32xf32> -> vector<64x32xf32>
    %39 = arith.mulf %35, %38 : vector<64x32xf32>
    %40 = tpu.concatenate %34, %34, %34, %34 in 0 : vector<16x32xf32>, vector<16x32xf32>, vector<16x32xf32>, vector<16x32xf32> -> vector<64x32xf32>
    %41 = arith.mulf %35, %40 : vector<64x32xf32>
    %cst_14 = arith.constant dense<0.000000e+00> : vector<16x64xf32>
    %42 = tpu.matmul %32, %39, %cst_14 {dimension_numbers = #tpu.dot_dimension_numbers<[1], [1], [0], [0], [0, 0, 1, 0], [], []>} : vector<16x32xf32>, vector<64x32xf32>, vector<16x64xf32> -> vector<16x64xf32>
    %cst_15 = arith.constant dense<0xFF800000> : vector<16xf32>
    %43 = vector.multi_reduction <maximumf>, %42, %cst_15 [1] : vector<16x64xf32> to vector<16xf32>
    %44 = vector.shape_cast %43 : vector<16xf32> to vector<16x1xf32>
    %45 = vector.broadcast %44 : vector<16x1xf32> to vector<16x64xf32>
    %46 = arith.subf %42, %45 : vector<16x64xf32>
    %47 = math.exp %46 : vector<16x64xf32>
    %cst_16 = arith.constant dense<0.000000e+00> : vector<16x64xf32>
    %48 = tpu.matmul %47, %36, %cst_16 {dimension_numbers = #tpu.dot_dimension_numbers<[1], [0], [0], [1], [0, 0, 1, 1], [], []>} : vector<16x64xf32>, vector<64x64xf32>, vector<16x64xf32> -> vector<16x64xf32>
    %49 = arith.mulf %47, %37 : vector<16x64xf32>
    %50 = tpu.reciprocal %48 {approx = true} : vector<16x64xf32> -> vector<16x64xf32>
    %51 = arith.mulf %49, %50 : vector<16x64xf32>
    %cst_17 = arith.constant dense<0.000000e+00> : vector<16x32xf32>
    %52 = tpu.matmul %51, %41, %cst_17 {dimension_numbers = #tpu.dot_dimension_numbers<[1], [0], [0], [1], [0, 0, 1, 1], [], []>} : vector<16x64xf32>, vector<64x32xf32>, vector<16x32xf32> -> vector<16x32xf32>
    %c40 = arith.constant 40 : index
    %c0_18 = arith.constant 0 : index
    %53 = vector.load %arg2[%c40, %c0_18] : memref<280x96xf32, #tpu.memory_space<vmem>>, vector<32x32xf32>
    %cst_19 = arith.constant dense<0.000000e+00> : vector<16x32xf32>
    %54 = tpu.matmul %52, %53, %cst_19 {dimension_numbers = #tpu.dot_dimension_numbers<[1], [0], [0], [1], [0, 0, 1, 1], [], []>} : vector<16x32xf32>, vector<32x32xf32>, vector<16x32xf32> -> vector<16x32xf32>
    %c35 = arith.constant 35 : index
    %c0_20 = arith.constant 0 : index
    %55 = vector.load %arg2[%c35, %c0_20] : memref<280x96xf32, #tpu.memory_space<vmem>>, vector<1x32xf32>
    %56 = vector.broadcast %55 : vector<1x32xf32> to vector<16x32xf32>
    %57 = arith.addf %54, %56 : vector<16x32xf32>
    %58 = arith.addf %0, %57 : vector<16x32xf32>
    %c72 = arith.constant 72 : index
    %c0_21 = arith.constant 0 : index
    %59 = vector.load %arg2[%c72, %c0_21] : memref<280x96xf32, #tpu.memory_space<vmem>>, vector<32x32xf32>
    %cst_22 = arith.constant dense<0.000000e+00> : vector<16x32xf32>
    %60 = tpu.matmul %58, %59, %cst_22 {dimension_numbers = #tpu.dot_dimension_numbers<[1], [0], [0], [1], [0, 0, 1, 1], [], []>} : vector<16x32xf32>, vector<32x32xf32>, vector<16x32xf32> -> vector<16x32xf32>
    %c36 = arith.constant 36 : index
    %c0_23 = arith.constant 0 : index
    %61 = vector.load %arg2[%c36, %c0_23] : memref<280x96xf32, #tpu.memory_space<vmem>>, vector<1x32xf32>
    %62 = vector.broadcast %61 : vector<1x32xf32> to vector<16x32xf32>
    %63 = arith.addf %60, %62 : vector<16x32xf32>
    %cst_24 = arith.constant 0.000000e+00 : f32
    %64 = vector.broadcast %cst_24 : f32 to vector<16x32xf32>
    %65 = arith.cmpf oge, %63, %64 : vector<16x32xf32>
    %cst_25 = arith.constant 2.000000e-01 : f32
    %66 = vector.broadcast %cst_25 : f32 to vector<16x32xf32>
    %67 = arith.mulf %66, %63 : vector<16x32xf32>
    %68 = arith.select %65, %63, %67 : vector<16x32xi1>, vector<16x32xf32>
    %c104 = arith.constant 104 : index
    %c0_26 = arith.constant 0 : index
    %69 = vector.load %arg2[%c104, %c0_26] : memref<280x96xf32, #tpu.memory_space<vmem>>, vector<32x32xf32>
    %cst_27 = arith.constant dense<0.000000e+00> : vector<16x32xf32>
    %70 = tpu.matmul %68, %69, %cst_27 {dimension_numbers = #tpu.dot_dimension_numbers<[1], [0], [0], [1], [0, 0, 1, 1], [], []>} : vector<16x32xf32>, vector<32x32xf32>, vector<16x32xf32> -> vector<16x32xf32>
    %c37 = arith.constant 37 : index
    %c0_28 = arith.constant 0 : index
    %71 = vector.load %arg2[%c37, %c0_28] : memref<280x96xf32, #tpu.memory_space<vmem>>, vector<1x32xf32>
    %72 = vector.broadcast %71 : vector<1x32xf32> to vector<16x32xf32>
    %73 = arith.addf %70, %72 : vector<16x32xf32>
    %74 = arith.addf %73, %73 : vector<16x32xf32>
    %cst_29 = arith.constant dense<0.000000e+00> : vector<16xf32>
    %75 = vector.multi_reduction <add>, %74, %cst_29 [1] : vector<16x32xf32> to vector<16xf32>
    %76 = vector.shape_cast %75 : vector<16xf32> to vector<16x1xf32>
    %cst_30 = arith.constant 3.200000e+01 : f32
    %77 = vector.broadcast %cst_30 : f32 to vector<16x1xf32>
    %78 = arith.divf %76, %77 : vector<16x1xf32>
    %79 = vector.broadcast %78 : vector<16x1xf32> to vector<16x32xf32>
    %80 = arith.subf %74, %79 : vector<16x32xf32>
    %81 = vector.broadcast %78 : vector<16x1xf32> to vector<16x32xf32>
    %82 = arith.subf %74, %81 : vector<16x32xf32>
    %83 = arith.mulf %80, %82 : vector<16x32xf32>
    %cst_31 = arith.constant dense<0.000000e+00> : vector<16xf32>
    %84 = vector.multi_reduction <add>, %83, %cst_31 [1] : vector<16x32xf32> to vector<16xf32>
    %85 = vector.shape_cast %84 : vector<16xf32> to vector<16x1xf32>
    %cst_32 = arith.constant 3.200000e+01 : f32
    %86 = vector.broadcast %cst_32 : f32 to vector<16x1xf32>
    %87 = arith.divf %85, %86 : vector<16x1xf32>
    %88 = vector.broadcast %78 : vector<16x1xf32> to vector<16x32xf32>
    %89 = arith.subf %74, %88 : vector<16x32xf32>
    %cst_33 = arith.constant 9.99999974E-6 : f32
    %90 = vector.broadcast %cst_33 : f32 to vector<16x1xf32>
    %91 = arith.addf %87, %90 : vector<16x1xf32>
    %92 = math.rsqrt %91 : vector<16x1xf32>
    %93 = vector.broadcast %92 : vector<16x1xf32> to vector<16x32xf32>
    %94 = arith.mulf %89, %93 : vector<16x32xf32>
    %c38 = arith.constant 38 : index
    %c0_34 = arith.constant 0 : index
    %95 = vector.load %arg2[%c38, %c0_34] : memref<280x96xf32, #tpu.memory_space<vmem>>, vector<1x32xf32>
    %96 = vector.broadcast %95 : vector<1x32xf32> to vector<16x32xf32>
    %97 = arith.mulf %94, %96 : vector<16x32xf32>
    %c39 = arith.constant 39 : index
    %c0_35 = arith.constant 0 : index
    %98 = vector.load %arg2[%c39, %c0_35] : memref<280x96xf32, #tpu.memory_space<vmem>>, vector<1x32xf32>
    %99 = vector.broadcast %98 : vector<1x32xf32> to vector<16x32xf32>
    %100 = arith.addf %97, %99 : vector<16x32xf32>
    %c0_36 = arith.constant 0 : index
    %c0_37 = arith.constant 0 : index
    %101 = vector.load %arg3[%c0_36, %c0_37] : memref<16x32xf32, #tpu.memory_space<vmem>>, vector<16x32xf32>
    tpu.vector_store %arg3[%c0_36, %c0_37], %100 {strides = array<i32>} : memref<16x32xf32, #tpu.memory_space<vmem>>, vector<16x32xf32>,
    return
  }
  func.func @transform_0(%arg0: i32) -> (i32, i32) {
    %c0_i32 = arith.constant 0 : i32
    %c0_i32_0 = arith.constant 0 : i32
    %c0_i32_1 = arith.constant 0 : i32
    return %c0_i32, %c0_i32_0 : i32, i32
  }
  func.func @transform_1(%arg0: i32) -> (i32, i32) {
    %c0_i32 = arith.constant 0 : i32
    %c0_i32_0 = arith.constant 0 : i32
    %c0_i32_1 = arith.constant 0 : i32
    return %c0_i32, %c0_i32_0 : i32, i32
  }
  func.func @transform_2(%arg0: i32) -> (i32, i32) {
    %c0_i32 = arith.constant 0 : i32
    %c0_i32_0 = arith.constant 0 : i32
    %c0_i32_1 = arith.constant 0 : i32
    return %c0_i32, %c0_i32_0 : i32, i32
  }
}

</mosaic_0001>

<bundles_post_ra>
// kernel: transformer_conv_forward.1
= control target key start
LH: loop header
LB: loop body
LE: loop exit
PB: predicated region body
PF: predicated region fallthrough
CT: control target
= control target key end

     0   :  { %7 = vsyncpa [#allocation3], 0  ;;  %s1376_s0 = inlined_call_operand.hbm [shape: f32[16,32], index: 0, kind: input, shape index: {}]   ;;  %s1377_s1 = inlined_call_operand.hbm [shape: f32[280,96], index: 1, kind: input, shape index: {}]   ;;  %s1378_s2 = inlined_call_operand.hbm [shape: f32[16,32], index: 2, kind: output, shape index: {}]  }
   0x1   :  { %8 = vsyncpa [#allocation6], 0 }
   0x2   :  { %9 = vsyncpa [#allocation4], 0  ;;  %s1214_s9 = smov [#allocation2]   ;;  %s1142_s13 = scalar_lea.hbm %s1376_s0, 256 }
   0x3   :  { %s15_s10 = sshll.u32 %s1214_s9, 4  ;;  %p1143_p0 = scmp.ne.s32.totalorder %s1376_s0, %s1142_s13  ;;  %s16_s10 = int_to_ptr.vmem [resolvable:$true] %s15_s10 }
   0x4   :  { %p1146_p1 = scmp.lt.u32.totalorder %s1142_s13, %s1376_s0 }
   0x6   :  { %p1148_p2 = pnand %p1146_p1, %p1143_p0 }
   0x8   :  { %1151 = shalt.err (!%p1148_p2)
}
   0x9   :  { %s1152_s18 = scalar_lea.vmem %s16_s10, 256  ;;  %p1157_p4 = scmp.lt.s32.totalorder %s16_s10, %s16_s10 }
   0xa   :  { %p1153_p3 = scmp.ne.s32.totalorder %s16_s10, %s1152_s18  ;;  %p1158_p5 = scmp.lt.s32.totalorder %s1152_s18, %s1152_s18 }
   0xc   :  { %p1159_p6 = por %p1158_p5, %p1157_p4 }
   0xe   :  { %p1160_p7 = pnand %p1159_p6, %p1153_p3 }
  0x10   :  { %1163 = shalt.err (!%p1160_p7)
}
  0x11   :  { %s1215_s19 = smov 128   ;;  %s1216_s20 = smov 8  }
  0x12   :  { %21 = dma.hbm_to_vmem [thread:$0]  %s1376_s0, 256, %s16_s10, [#allocation3], %s1215_s19, %s1215_s19, %s1216_s20  }
  0x13   :  { %s1217_s23 = smov [#allocation5]   ;;  %s1164_s27 = scalar_lea.hbm %s1377_s1, 4480 }
  0x14   :  { %s27_s24 = sshll.u32 %s1217_s23, 4  ;;  %p1165_p8 = scmp.ne.s32.totalorder %s1377_s1, %s1164_s27  ;;  %s28_s24 = int_to_ptr.vmem [resolvable:$true] %s27_s24 }
  0x15   :  { %p1168_p9 = scmp.lt.u32.totalorder %s1164_s27, %s1377_s1 }
  0x17   :  { %p1170_p10 = pnand %p1168_p9, %p1165_p8 }
  0x19   :  { %1173 = shalt.err (!%p1170_p10)
}
  0x1a   :  { %s1174_s4 = scalar_lea.vmem %s28_s24, 4480  ;;  %p1179_p12 = scmp.lt.s32.totalorder %s28_s24, %s28_s24 }
  0x1b   :  { %p1175_p11 = scmp.ne.s32.totalorder %s28_s24, %s1174_s4  ;;  %p1180_p13 = scmp.lt.s32.totalorder %s1174_s4, %s1174_s4 }
  0x1d   :  { %p1181_p0 = por %p1180_p13, %p1179_p12 }
  0x1f   :  { %p1182_p1 = pnand %p1181_p0, %p1175_p11 }
  0x21   :  { %1185 = shalt.err (!%p1182_p1)
}
  0x22   :  { %33 = dma.hbm_to_vmem [thread:$0]  %s1377_s1, 4480, %s28_s24, [#allocation6], %s1215_s19, %s1215_s19, %s1216_s20  }
  0x23   :  { %1208 = dma.done.wait [#allocation3], 256  }
  0x24   :  { %1209 = vsyncadd [#allocation3], 4294967040 }
  0x25   :  { %1210 = dma.done.wait [#allocation6], 4480  }
  0x26   :  { %1211 = vsyncadd [#allocation6], 4294962816  ;;  %vm42_vm0 = vcmask 261120   ;;  %v1266_v0 = vld [vmem:[#allocation2] sm:$0xff]  ;;  %v1268_v1 = vld [vmem:[#allocation2 + $0x8] sm:$0xff]  ;;  %s1218_s1 = smov 96  }
  0x27   :  { %v43_v2 = vsel %vm42_vm0, %v1266_v0, 0.0  ;;  %v46_v3 = vsel %vm42_vm0, %v1268_v1, 0.0  ;;  %v84_v14 = vld [vmem:[#allocation5] sm:$0xff]  ;;  %v85_v15 = vld [vmem:[#allocation5 + $0x8] sm:$0xff]  ;;  %v86_v16 = vld [vmem:[#allocation5 + $0x10] sm:$0xff]  ;;  %vm325_vm2 = vcmask 523264  }
  0x28   :  { %44 = vadd.xlane.f32.xlu0 %v43_v2  ;;  %v1031_v17 = vpack.c.bf16 %v85_v15, %v84_v14  ;;  %v87_v18 = vld [vmem:[#allocation5 + $0x18] sm:$0xff]  ;;  %v846_v27 = vld [vmem:[#allocation5 + $0x21] ss:$0 sm:$0xff]  ;;  %v847_v29 = vld [vmem:[#allocation5 + $0x22] ss:$0 sm:$0xff]  ;;  %s1219_s6 = smov 64  }
  0x29   :  { %v1035_v19 = vpack.c.bf16 %v87_v18, %v86_v16  ;;  %v848_v36 = vld [vmem:[#allocation5 + $0x20] ss:$0 sm:$0xff]  ;;  %v1285_v41 = vld [vmem:[#allocation5 + $0x90] sm:$0xff]  ;;  %v1289_v43 = vld [vmem:[#allocation5 + $0x98] sm:$0xff]  ;;  %s1220_s7 = smov [#allocation7]  }
  0x2a   :  { %1032 = vmatprep.subr.bf16.mxu0 %v1031_v17  ;;  %v1287_v42 = vld [vmem:[#allocation5 + $0xa0] sm:$0xff]  ;;  %v1291_v44 = vld [vmem:[#allocation5 + $0x88] sm:$0xff]  ;;  %vm1299_vm1 = vmpackc.low %vm42_vm0, %vm42_vm0  ;;  %s833_s8 = sshll.u32 %s1220_s7, 4  ;;  %s834_s8 = int_to_ptr.vmem [resolvable:$true] %s833_s8 }
  0x2b   :  { %1034 = vmatpush3.bf16.msra.mxu0 %v1031_v17  ;;  %v1305_v54 = vld [vmem:[#allocation5 + $0xb0] sm:$0xff]  ;;  %v1307_v55 = vld [vmem:[#allocation5 + $0xa8] sm:$0xff]  ;;  %v1315_v59 = vld [vmem:[#allocation5 + $0xc0] sm:$0xff]  ;;  %s1186_s9 = scalar_lea.vmem %s834_s8, 256  ;;  %p1191_p3 = scmp.lt.s32.totalorder %s834_s8, %s834_s8 }
  0x2c   :  { %47 = vadd.xlane.f32.xlu0 %v46_v3  ;;  %1036 = vmatprep.subr.bf16.mxu0 %v1035_v19  ;;  %v1317_v60 = vld [vmem:[#allocation5 + $0xb8] sm:$0xff]  ;;  %v182_v2 = vld [vmem:[#allocation5 + $0xc8] sm:$0xff]  ;;  %v183_v3 = vld [vmem:[#allocation5 + $0xd0] sm:$0xff]  ;;  %p1187_p2 = scmp.ne.s32.totalorder %s834_s8, %s1186_s9  ;;  %p1192_p4 = scmp.lt.s32.totalorder %s1186_s9, %s1186_s9 }
  0x2d   :  { %v188_v15 = vld [vmem:[#allocation5 + $0xf8] sm:$0xff]  ;;  %v189_v16 = vld [vmem:[#allocation5 + $0x100] sm:$0xff] }
  0x2e   :  { %v1075_v17 = vpack.c.bf16 %v189_v16, %v188_v15  ;;  %v868_v15 = vld [vmem:[#allocation5 + $0x24] ss:$0 sm:$0xff]  ;;  %p1193_p5 = por %p1192_p4, %p1191_p3 }
  0x2f   :  { %1038 = vmatpush3.bf16.msra.mxu0 %v1035_v19 }
  0x30   :  { %p1194_p6 = pnand %p1193_p5, %p1187_p2 }
  0xb5   :  { %v45_v4 = vpop.xlane.xlu0 %44 }
  0xb6   :  { %v50_v5 = vmul.f32 0.03125, %v45_v4  ;;  %v184_v4 = vld [vmem:[#allocation5 + $0xd8] sm:$0xff] }
  0xb8   :  { %v52_v6 = vsub.f32 %v1266_v0, %v50_v5  ;;  %v1063_v5 = vpack.c.bf16 %v183_v3, %v182_v2  ;;  %v865_v2 = vld [vmem:[#allocation5 + $0x23] ss:$0 sm:$0xff] }
  0xb9   :  { %v48_v7 = vpop.xlane.xlu0 %47 }
  0xba   :  { %v51_v8 = vmul.f32 0.03125, %v48_v7  ;;  %v54_v9 = vmul.f32 %v52_v6, %v52_v6  ;;  %1064 = vmatprep.subr.bf16.mxu0 %v1063_v5 }
  0xbc   :  { %v53_v10 = vsub.f32 %v1268_v1, %v51_v8  ;;  %v56_v11 = vsel %vm42_vm0, %v54_v9, 0.0 }
  0xbd   :  { %57 = vadd.xlane.f32.xlu1 %v56_v11 }
  0xbe   :  { %v55_v12 = vmul.f32 %v53_v10, %v53_v10 }
  0xc0   :  { %v59_v13 = vsel %vm42_vm0, %v55_v12, 0.0  ;;  %v186_v12 = vld [vmem:[#allocation5 + $0xe8] sm:$0xff] }
  0xc1   :  { %60 = vadd.xlane.f32.xlu1 %v59_v13  ;;  %v187_v13 = vld [vmem:[#allocation5 + $0xf0] sm:$0xff] }
  0xc2   :  { %v1071_v14 = vpack.c.bf16 %v187_v13, %v186_v12  ;;  %v696_v12 = vld [vmem:[#allocation5 + $0x78] sm:$0xff]  ;;  %v697_v13 = vld [vmem:[#allocation5 + $0x80] sm:$0xff] }
 0x14a   :  { %v58_v20 = vpop.xlane.xlu1 %57 }
 0x14b   :  { %v62_v21 = vmul.f32 0.03125, %v58_v20 }
 0x14d   :  { %v64_v22 = vadd.f32 1e-05, %v62_v21 }
 0x14e   :  { %v61_v23 = vpop.xlane.xlu1 %60 }
 0x14f   :  { %1126 = vrsqrt.f32 %v64_v22  ;;  %v63_v24 = vmul.f32 0.03125, %v61_v23 }
 0x151   :  { %v65_v25 = vadd.f32 1e-05, %v63_v24 }
 0x153   :  { %1128 = vrsqrt.f32 %v65_v25 }
 0x159   :  { %v1127_v26 = vpop.eup %1126 }
 0x15a   :  { %v68_v28 = vmul.f32 %v1127_v26, %v52_v6  ;;  %v185_v6 = vld [vmem:[#allocation5 + $0xe0] sm:$0xff] }
 0x15b   :  { %v1067_v7 = vpack.c.bf16 %v185_v6, %v184_v4 }
 0x15c   :  { %v75_v30 = vmul.f32 %v846_v27, %v68_v28 }
 0x15d   :  { %v1129_v31 = vpop.eup %1128 }
 0x15e   :  { %v69_v32 = vmul.f32 %v1129_v31, %v53_v10  ;;  %v82_v33 = vadd.f32 %v847_v29, %v75_v30 }
 0x160   :  { %v76_v34 = vmul.f32 %v846_v27, %v69_v32  ;;  %938 = vmatprep.mubr.msk.f32.mxu0 %vm42_vm0, %v82_v33 }
 0x162   :  { %v83_v35 = vadd.f32 %v847_v29, %v76_v34 }
 0x164   :  { %939 = vmatmul.mubr.msk.f32.vlgmr.msra.gmra.mrb[0].mxu0 %vm42_vm0, %v83_v35 }
 0x165   :  { %1066 = vmatpush3.bf16.msra.mxu0 %v1063_v5 }
 0x166   :  { %1068 = vmatprep.subr.bf16.mxu0 %v1067_v7 }
 0x169   :  { %1070 = vmatpush3.bf16.msra.mxu0 %v1067_v7 }
 0x16a   :  { %1072 = vmatprep.subr.bf16.mxu0 %v1071_v14 }
 0x16d   :  { %1074 = vmatpush3.bf16.msra.mxu0 %v1071_v14  ;;  %v1115_v14 = vpack.c.bf16 %v697_v13, %v696_v12 }
 0x16e   :  { %1076 = vmatprep.subr.bf16.mxu0 %v1075_v17 }
 0x171   :  { %1078 = vmatpush3.bf16.msra.mxu0 %v1075_v17 }
 0x237   :  { %v940_v37 = vpop.f32.mrb[0].mxu0 }
 0x238   :  { %v171_v38 = vadd.f32 %v940_v37, %v848_v36  ;;  %v165_v39 = vpop.f32.mrb[1].mxu0 }
 0x239   :  { %v1280_v40 = vadd.f32 %v848_v36, %v165_v39 }
 0x23a   :  { %196 = vrot.lane.b32.xlu1 %v171_v38, %s1218_s1 }
 0x23b   :  { %194 = vrot.lane.b32.xlu0 %v1280_v40, %s1218_s1  ;;  %957 = vmatprep.mubr.msk.f32.mxu1 %vm42_vm0, %v1280_v40 }
 0x2ac   :  { %v197_v45 = vpop.permute.xlu1 %196 }
 0x2ad   :  { %v195_v46 = vpop.permute.xlu0 %194  ;;  %v201_v47 = vmul.f32 %v197_v45, %v1285_v41  ;;  %v203_v48 = vmul.f32 %v197_v45, %v1287_v42  ;;  %v205_v56 = vmul.f32 %v197_v45, %v1305_v54  ;;  %v207_v61 = vmul.f32 %v197_v45, %v1315_v59 }
 0x2ae   :  { %v202_v49 = vmul.f32 %v195_v46, %v1289_v43  ;;  %v200_v50 = vmul.f32 %v195_v46, %v1291_v44  ;;  %v204_v57 = vmul.f32 %v195_v46, %v1307_v55  ;;  %v206_v62 = vmul.f32 %v195_v46, %v1317_v60 }
 0x2b0   :  { %v1039_v52 = vpack.c.bf16 %v201_v47, %v200_v50  ;;  %v1045_v53 = vpack.c.bf16 %v203_v48, %v202_v49  ;;  %v1051_v58 = vpack.c.bf16 %v205_v56, %v204_v57  ;;  %v1057_v63 = vpack.c.bf16 %v207_v61, %v206_v62  ;;  %v191_v48 = vld [vmem:[#allocation5 + $0x110] sm:$0xff]  ;;  %v190_v49 = vld [vmem:[#allocation5 + $0x108] sm:$0xff]  ;;  %v600_v61 = vld [vmem:[#allocation5 + $0x58] sm:$0xff] }
 0x2b1   :  { %v598_v56 = vld [vmem:[#allocation5 + $0x48] sm:$0xff]  ;;  %v599_v57 = vld [vmem:[#allocation5 + $0x50] sm:$0xff]  ;;  %v601_v62 = vld [vmem:[#allocation5 + $0x60] sm:$0xff] }
 0x2b2   :  { %1041 = vmatprep.subr.msk.bf16.mxu1 %vm1299_vm1, %v1039_v52 }
 0x2b3   :  { %1044 = vmatpush3.bf16.xpose.msk.msra.mxu1 %vm1299_vm1, %v1039_v52 }
 0x2b4   :  { %1047 = vmatprep.subr.msk.bf16.mxu1 %vm1299_vm1, %v1045_v53 }
 0x2bb   :  { %1050 = vmatpush3.bf16.xpose.msk.msra.mxu1 %vm1299_vm1, %v1045_v53 }
 0x2bc   :  { %1053 = vmatprep.subr.msk.bf16.mxu1 %vm1299_vm1, %v1051_v58 }
 0x2c3   :  { %1056 = vmatpush3.bf16.xpose.msk.msra.mxu1 %vm1299_vm1, %v1051_v58  ;;  %v1103_v58 = vpack.c.bf16 %v599_v57, %v598_v56 }
 0x2c4   :  { %1059 = vmatprep.subr.msk.bf16.mxu1 %vm1299_vm1, %v1057_v63 }
 0x2cb   :  { %1062 = vmatpush3.bf16.xpose.msk.msra.mxu1 %vm1299_vm1, %v1057_v63  ;;  %v1107_v63 = vpack.c.bf16 %v601_v62, %v600_v61 }
 0x2d2   :  { %958 = vmatmul.mubr.msk.f32.vlgmr.msra.gmra.mrb[0].mxu1 %vm42_vm0, %v171_v38 }
 0x3a5   :  { %v959_v8 = vpop.f32.mrb[0].mxu1 }
 0x3a6   :  { %v316_v9 = vpop.f32.mrb[1].mxu1  ;;  %v329_v10 = vsel %vm325_vm2, %v959_v8, -inf }
 0x3a7   :  { %330 = vmax.xlane.f32.xlu0 %v329_v10  ;;  %v326_v11 = vsel %vm325_vm2, %v316_v9, -inf  ;;  %v695_v10 = vld [vmem:[#allocation5 + $0x70] sm:$0xff] }
 0x3a8   :  { %327 = vmax.xlane.f32.xlu1 %v326_v11 }
 0x3b9   :  { %210 = vrot.lane.b32.xlu1 %v171_v38, %s1219_s6 }
 0x3bd   :  { %208 = vrot.lane.b32.xlu0 %v1280_v40, %s1219_s6  ;;  %v506_v40 = vld [vmem:[#allocation5 + $0x28] sm:$0xff] }
 0x434   :  { %v331_v18 = vpop.xlane.xlu0 %330 }
 0x435   :  { %v333_v19 = vsub.f32 %v959_v8, %v331_v18  ;;  %v328_v20 = vpop.xlane.xlu1 %327 }
 0x436   :  { %v332_v21 = vsub.f32 %v316_v9, %v328_v20  ;;  %v694_v9 = vld [vmem:[#allocation5 + $0x68] sm:$0xff] }
 0x437   :  { %v336_v22 = vmul.f32 1.442695, %v333_v19  ;;  %v1111_v11 = vpack.c.bf16 %v695_v10, %v694_v9 }
 0x438   :  { %v334_v23 = vmul.f32 1.442695, %v332_v21  ;;  %v209_v24 = vpop.permute.xlu0 %208 }
 0x439   :  { %v214_v25 = vmul.f32 %v209_v24, %v1291_v44  ;;  %v211_v26 = vpop.permute.xlu1 %210  ;;  %v216_v29 = vmul.f32 %v209_v24, %v1289_v43  ;;  %v218_v33 = vmul.f32 %v209_v24, %v1307_v55  ;;  %v220_v36 = vmul.f32 %v209_v24, %v1317_v60  ;;  %v509_v44 = vld [vmem:[#allocation5 + $0x40] sm:$0xff] }
 0x43a   :  { %1130 = vpow2.f32 %v334_v23  ;;  %v215_v27 = vmul.f32 %v211_v26, %v1285_v41  ;;  %v217_v30 = vmul.f32 %v211_v26, %v1287_v42  ;;  %v219_v34 = vmul.f32 %v211_v26, %v1305_v54  ;;  %v507_v41 = vld [vmem:[#allocation5 + $0x30] sm:$0xff]  ;;  %v508_v42 = vld [vmem:[#allocation5 + $0x38] sm:$0xff] }
 0x43b   :  { %1132 = vpow2.f32 %v336_v22  ;;  %v221_v37 = vmul.f32 %v211_v26, %v1315_v59  ;;  %v1095_v43 = vpack.c.bf16 %v507_v41, %v506_v40  ;;  %v1099_v45 = vpack.c.bf16 %v509_v44, %v508_v42  ;;  %v871_v22 = vld [vmem:[#allocation5 + $0x25] ss:$0 sm:$0xff] }
 0x43c   :  { %v1079_v28 = vpack.c.bf16 %v215_v27, %v214_v25  ;;  %v1083_v35 = vpack.c.bf16 %v217_v30, %v216_v29  ;;  %v1087_v38 = vpack.c.bf16 %v219_v34, %v218_v33 }
 0x43d   :  { %v1091_v39 = vpack.c.bf16 %v221_v37, %v220_v36  ;;  %1096 = vmatprep.subr.bf16.mxu1 %v1095_v43 }
 0x43e   :  { %1080 = vmatprep.subr.bf16.mxu0 %v1079_v28  ;;  %1098 = vmatpush3.bf16.msra.mxu1 %v1095_v43 }
 0x43f   :  { %1100 = vmatprep.subr.bf16.mxu1 %v1099_v45 }
 0x442   :  { %1102 = vmatpush3.bf16.msra.mxu1 %v1099_v45 }
 0x443   :  { %1112 = vmatprep.subr.bf16.mxu1 %v1111_v11 }
 0x444   :  { %v1131_v31 = vpop.eup %1130 }
 0x445   :  { %v1133_v32 = vpop.eup %1132  ;;  %976 = vmatprep.mubr.msk.f32.mxu0 %vm325_vm2, %v1131_v31  ;;  %v419_v52 = vmul.f32 %v1131_v31, %v190_v49 }
 0x446   :  { %977 = vmatmul.mubr.msk.f32.vlgmr.msra.gmra.mrb[2].mxu0 %vm325_vm2, %v1133_v32  ;;  %v420_v50 = vmul.f32 %v1133_v32, %v191_v48  ;;  %v874_v48 = vld [vmem:[#allocation5 + $0x26] ss:$0 sm:$0xff] }
 0x447   :  { %1082 = vmatpush3.bf16.msra.mxu0 %v1079_v28 }
 0x448   :  { %1084 = vmatprep.subr.bf16.mxu0 %v1083_v35 }
 0x44b   :  { %1086 = vmatpush3.bf16.msra.mxu0 %v1083_v35 }
 0x44c   :  { %1088 = vmatprep.subr.bf16.mxu0 %v1087_v38 }
 0x44f   :  { %1090 = vmatpush3.bf16.msra.mxu0 %v1087_v38 }
 0x450   :  { %1092 = vmatprep.subr.bf16.mxu0 %v1091_v39 }
 0x453   :  { %1094 = vmatpush3.bf16.msra.mxu0 %v1091_v39 }
 0x454   :  { %1104 = vmatprep.subr.bf16.mxu0 %v1103_v58 }
 0x519   :  { %v978_v46 = vpop.f32.mrb[2].mxu0 }
 0x51a   :  { %1134 = vrcp.f32 %v978_v46  ;;  %v410_v47 = vpop.f32.mrb[3].mxu0 }
 0x51b   :  { %1136 = vrcp.f32 %v410_v47 }
 0x524   :  { %v1135_v51 = vpop.eup %1134 }
 0x525   :  { %v1137_v53 = vpop.eup %1136  ;;  %v424_v54 = vmul.f32 %v1135_v51, %v420_v50 }
 0x526   :  { %v423_v55 = vmul.f32 %v1137_v53, %v419_v52  ;;  %v875_v52 = vld [vmem:[#allocation5 + $0x27] ss:$0 sm:$0xff] }
 0x528   :  { %995 = vmatprep.mubr.msk.f32.mxu0 %vm325_vm2, %v423_v55 }
 0x529   :  { %996 = vmatmul.mubr.msk.f32.vlgmr.msra.gmra.mrb[4].mxu0 %vm325_vm2, %v424_v54 }
 0x52a   :  { %1106 = vmatpush3.bf16.msra.mxu0 %v1103_v58 }
 0x52b   :  { %1108 = vmatprep.subr.bf16.mxu0 %v1107_v63 }
 0x52e   :  { %1110 = vmatpush3.bf16.msra.mxu0 %v1107_v63 }
 0x5fc   :  { %v997_v59 = vpop.f32.mrb[4].mxu0 }
 0x5fd   :  { %v497_v60 = vpop.f32.mrb[5].mxu0 }
 0x5fe   :  { %1006 = vmatprep.mubr.msk.f32.mxu1 %vm42_vm0, %v497_v60 }
 0x5ff   :  { %1007 = vmatmul.mubr.msk.f32.vlgmr.msra.gmra.mrb[2].mxu1 %vm42_vm0, %v997_v59 }
 0x600   :  { %1114 = vmatpush3.bf16.msra.mxu1 %v1111_v11 }
 0x601   :  { %1116 = vmatprep.subr.bf16.mxu1 %v1115_v14 }
 0x604   :  { %1118 = vmatpush3.bf16.msra.mxu1 %v1115_v14 }
 0x6d2   :  { %v1008_v3 = vpop.f32.mrb[2].mxu1 }
 0x6d3   :  { %v593_v4 = vadd.f32 %v1008_v3, %v865_v2  ;;  %v587_v5 = vpop.f32.mrb[3].mxu1 }
 0x6d4   :  { %v588_v6 = vadd.f32 %v865_v2, %v587_v5 }
 0x6d5   :  { %v597_v8 = vadd.f32 %v593_v4, %v1268_v1 }
 0x6d6   :  { %v596_v7 = vadd.f32 %v588_v6, %v1266_v0 }
 0x6d8   :  { %1017 = vmatprep.mubr.msk.f32.mxu0 %vm42_vm0, %v596_v7 }
 0x6d9   :  { %1018 = vmatmul.mubr.msk.f32.vlgmr.msra.gmra.mrb[6].mxu0 %vm42_vm0, %v597_v8 }
 0x7ac   :  { %v1019_v16 = vpop.f32.mrb[6].mxu0 }
 0x7ad   :  { %v685_v17 = vadd.f32 %v1019_v16, %v868_v15  ;;  %v679_v0 = vpop.f32.mrb[7].mxu0 }
 0x7ae   :  { %v680_v18 = vadd.f32 %v868_v15, %v679_v0 }
 0x7af   :  { %v691_v1 = vmul.f32 0.2, %v685_v17  ;;  %vm689_vm3 = vcmp.ge.f32.partialorder %v685_v17, 0.0 }
 0x7b0   :  { %vm688_vm4 = vcmp.ge.f32.partialorder %v680_v18, 0.0  ;;  %v690_v19 = vmul.f32 0.2, %v680_v18 }
 0x7b1   :  { %v693_v21 = vsel %vm689_vm3, %v685_v17, %v691_v1 }
 0x7b2   :  { %v692_v20 = vsel %vm688_vm4, %v680_v18, %v690_v19 }
 0x7b3   :  { %1028 = vmatprep.mubr.msk.f32.mxu1 %vm42_vm0, %v692_v20 }
 0x7b4   :  { %1029 = vmatmul.mubr.msk.f32.vlgmr.msra.gmra.mrb[4].mxu1 %vm42_vm0, %v693_v21 }
 0x887   :  { %v1030_v23 = vpop.f32.mrb[4].mxu1 }
 0x888   :  { %v781_v24 = vadd.f32 %v1030_v23, %v871_v22  ;;  %v775_v25 = vpop.f32.mrb[5].mxu1 }
 0x889   :  { %v776_v26 = vadd.f32 %v871_v22, %v775_v25 }
 0x88a   :  { %v785_v27 = vadd.f32 %v781_v24, %v781_v24 }
 0x88b   :  { %v784_v28 = vadd.f32 %v776_v26, %v776_v26 }
 0x88c   :  { %v789_v29 = vsel %vm42_vm0, %v785_v27, 0.0 }
 0x88d   :  { %790 = vadd.xlane.f32.xlu0 %v789_v29  ;;  %v786_v30 = vsel %vm42_vm0, %v784_v28, 0.0 }
 0x88e   :  { %787 = vadd.xlane.f32.xlu1 %v786_v30 }
 0x91a   :  { %v791_v31 = vpop.xlane.xlu0 %790 }
 0x91b   :  { %v793_v32 = vmul.f32 0.03125, %v791_v31  ;;  %v788_v33 = vpop.xlane.xlu1 %787 }
 0x91c   :  { %v792_v34 = vmul.f32 0.03125, %v788_v33 }
 0x91d   :  { %v795_v35 = vsub.f32 %v785_v27, %v793_v32 }
 0x91e   :  { %v794_v36 = vsub.f32 %v784_v28, %v792_v34 }
 0x91f   :  { %v797_v37 = vmul.f32 %v795_v35, %v795_v35 }
 0x920   :  { %v796_v38 = vmul.f32 %v794_v36, %v794_v36 }
 0x921   :  { %v801_v39 = vsel %vm42_vm0, %v797_v37, 0.0 }
 0x922   :  { %802 = vadd.xlane.f32.xlu1 %v801_v39  ;;  %v798_v40 = vsel %vm42_vm0, %v796_v38, 0.0 }
 0x923   :  { %799 = vadd.xlane.f32.xlu0 %v798_v40 }
 0x9af   :  { %v803_v41 = vpop.xlane.xlu1 %802 }
 0x9b0   :  { %v805_v42 = vmul.f32 0.03125, %v803_v41  ;;  %v800_v43 = vpop.xlane.xlu0 %799 }
 0x9b1   :  { %v804_v44 = vmul.f32 0.03125, %v800_v43 }
 0x9b2   :  { %v807_v45 = vadd.f32 1e-05, %v805_v42 }
 0x9b3   :  { %v806_v46 = vadd.f32 1e-05, %v804_v44 }
 0x9b4   :  { %1138 = vrsqrt.f32 %v807_v45 }
 0x9b5   :  { %1140 = vrsqrt.f32 %v806_v46 }
 0x9be   :  { %v1139_v47 = vpop.eup %1138 }
 0x9bf   :  { %v1141_v49 = vpop.eup %1140  ;;  %v811_v50 = vmul.f32 %v1139_v47, %v795_v35 }
 0x9c0   :  { %v810_v51 = vmul.f32 %v1141_v49, %v794_v36 }
 0x9c1   :  { %v818_v53 = vmul.f32 %v874_v48, %v811_v50 }
 0x9c2   :  { %v817_v54 = vmul.f32 %v874_v48, %v810_v51 }
 0x9c3   :  { %v825_v55 = vadd.f32 %v875_v52, %v818_v53 }
 0x9c4   :  { %v824_v56 = vadd.f32 %v875_v52, %v817_v54 }
 0x9c5   :  { %827 = vst.msk [vmem:[#allocation7 + $0x8] sm:$0xff] %vm42_vm0, %v825_v55 }
 0x9c6   :  { %826 = vst.msk [vmem:[#allocation7] sm:$0xff] %vm42_vm0, %v824_v56 }
 0x9c7   :  { %1197 = shalt.err (!%p1194_p6)
}
 0x9c8   :  { %s1198_s12 = scalar_lea.hbm %s1378_s2, 256 }
 0x9c9   :  { %p1199_p7 = scmp.ne.s32.totalorder %s1378_s2, %s1198_s12  ;;  %p1202_p8 = scmp.lt.u32.totalorder %s1198_s12, %s1378_s2 }
 0x9cb   :  { %p1204_p9 = pnand %p1202_p8, %p1199_p7 }
 0x9cd   :  { %1207 = shalt.err (!%p1204_p9)
}
 0x9ce   :  { %839 = dma.vmem_to_hbm [thread:$0]  %s834_s8, 256, %s1378_s2, [#allocation4], %s1215_s19, %s1215_s19, %s1216_s20  }
 0x9cf   :  { %1212 = dma.done.wait [#allocation4], 256  }
 0x9d0   :  { %1213 = vsyncadd [#allocation4], 4294967040 }
 0x9d1   :  { %843 = vsyncpa [#allocation3], 1 }
 0x9d2   :  { %844 = vsyncpa [#allocation6], 1 }
 0x9d3   :  { %845 = vsyncpa [#allocation4], 1 }

</bundles_post_ra>
